<compile_context>
chip_gen: v7x
topology: tpu7x:2x2x1
jax: 0.10.0
libtpu: 0.0.40
codegen_flags: <defaults>
</compile_context>

<pallas_src>
import jax
import jax.numpy as jnp
from jax.experimental import pallas as pl
from jax.experimental.pallas import tpu as pltpu


def _bcast_mul_kernel(s_ref, x_ref, o_ref):
    # s_ref: (TILE_C, 1), x_ref/o_ref: (TILE_C, TILE_HW).
    # Pure VPU broadcast multiply over one lane-dense tile.
    o_ref[...] = x_ref[...] * s_ref[...]


def _round_up(x, m):
    return ((x + m - 1) // m) * m


def _choose_tiles(nc, hw, itemsize):
    sublane = max(8, 32 // itemsize)  # 8 for f32, 16 for bf16, 32 for int8
    lane = 128
    # ~2 MiB tiles already reach ~85% of HBM roofline and keep the
    # double-buffered footprint safe on every generation (v5e 16 MiB scoped,
    # v6e 32/128 MiB, v7x 32/64 MiB).
    max_tile_bytes = 2 * 1024 * 1024

    # Lane tile: prefer the full hw dim (exempt from the 128 rule, contiguous
    # rows in HBM, no padding). Only tile hw when even one sublane-group of
    # full-width rows would blow the per-tile budget.
    if hw * sublane * itemsize <= max_tile_bytes:
        tile_hw = hw
    else:
        tile_hw = max(lane, (max_tile_bytes // (sublane * itemsize)) // lane * lane)

    # Sublane tile: budget cap, but aim for ~4 grid steps along nc so the DMA
    # pipeline double-buffers and v7x megacore has >= 2 programs to split.
    cap = max(sublane, (max_tile_bytes // (tile_hw * itemsize)) // sublane * sublane)
    tile_c = min(cap, _round_up(pl.cdiv(nc, 4), sublane))
    if tile_c >= nc:
        tile_c = nc  # full-dim block: exempt from the 8 rule (covers nc < 8)
    return tile_c, tile_hw


def broadcast_mul(scale, x):
    """Computes scale * x with scale: (N, C, 1, 1), x: (N, C, H, W)."""
    n, c, h, w = x.shape
    assert scale.shape == (n, c, 1, 1)
    assert scale.dtype == x.dtype

    nc = n * c
    hw = h * w
    itemsize = jnp.dtype(x.dtype).itemsize
    tile_c, tile_hw = _choose_tiles(nc, hw, itemsize)

    # Free, metadata-only reshapes (row-major contiguous) — no pad, no slice.
    x2d = x.reshape(nc, hw)
    s2d = scale.reshape(nc, 1)

    grid = (pl.cdiv(nc, tile_c), pl.cdiv(hw, tile_hw))

    out2d = pl.pallas_call(
        _bcast_mul_kernel,
        out_shape=jax.ShapeDtypeStruct((nc, hw), x.dtype),
        grid_spec=pltpu.PrefetchScalarGridSpec(
            num_scalar_prefetch=0,
            grid=grid,
            in_specs=[
                # Scale block is j-invariant -> not re-fetched across the
                # inner hw loop.
                pl.BlockSpec((tile_c, 1), lambda i, j: (i, 0)),
                pl.BlockSpec((tile_c, tile_hw), lambda i, j: (i, j)),
            ],
            out_specs=pl.BlockSpec((tile_c, tile_hw), lambda i, j: (i, j)),
        ),
        compiler_params=pltpu.CompilerParams(
            # Both axes independent -> shard across v7x's 2 TensorCores;
            # harmless no-op on single-TC v5e/v6e.
            dimension_semantics=("parallel", "parallel"),
        ),
        cost_estimate=pl.CostEstimate(
            flops=nc * hw,
            transcendentals=0,
            bytes_accessed=(2 * nc * hw + nc) * itemsize,
        ),
    )(s2d, x2d)

    return out2d.reshape(n, c, h, w)


if __name__ == "__main__":
    key = jax.random.PRNGKey(0)
    k1, k2, k3, k4 = jax.random.split(key, 4)

    # The module's shape: (1, 672, 1, 1) * (1, 672, 14, 14).
    x219 = jax.random.normal(k1, (1, 672, 14, 14), dtype=jnp.float32)
    x224 = jax.random.normal(k2, (1, 672, 1, 1), dtype=jnp.float32)
    out = jax.block_until_ready(broadcast_mul(x224, x219))
    ref = x224 * x219
    assert out.shape == ref.shape
    assert jnp.allclose(out, ref, atol=1e-6, rtol=1e-6)

    # Small batched case (batch folded into channel axis).
    xb = jax.random.normal(k3, (2, 16, 14, 14), dtype=jnp.float32)
    sb = jax.random.normal(k4, (2, 16, 1, 1), dtype=jnp.float32)
    outb = jax.block_until_ready(broadcast_mul(sb, xb))
    refb = sb * xb
    assert outb.shape == refb.shape
    assert jnp.allclose(outb, refb, atol=1e-6, rtol=1e-6)

    print("KERNEL_OK")
</pallas_src>

<mosaic_0001>
module attributes {stable_mosaic.version = 11 : i64} {
  func.func @_bcast_mul_kernel(%arg0: i32, %arg1: i32, %arg2: memref<168x1xf32, #tpu.memory_space<vmem>>, %arg3: memref<168x196xf32, #tpu.memory_space<vmem>>, %arg4: memref<168x196xf32, #tpu.memory_space<vmem>>) attributes {dimension_semantics = [#tpu.dimension_semantics<parallel>, #tpu.dimension_semantics<parallel>], iteration_bounds = array<i64: 4, 1>, scalar_prefetch = 0 : i64, scratch_operands = 0 : i64, tpu.core_type = #tpu.core_type<tc>, window_params = [{transform_indices = @transform_0, window_bounds = array<i64: 168, 1>}, {transform_indices = @transform_1, window_bounds = array<i64: 168, 196>}, {transform_indices = @transform_2, window_bounds = array<i64: 168, 196>}]} {
    %c0 = arith.constant 0 : index
    %c0_0 = arith.constant 0 : index
    %0 = vector.load %arg3[%c0, %c0_0] : memref<168x196xf32, #tpu.memory_space<vmem>>, vector<168x196xf32>
    %c0_1 = arith.constant 0 : index
    %c0_2 = arith.constant 0 : index
    %1 = vector.load %arg2[%c0_1, %c0_2] : memref<168x1xf32, #tpu.memory_space<vmem>>, vector<168x1xf32>
    %2 = vector.broadcast %1 : vector<168x1xf32> to vector<168x196xf32>
    %3 = arith.mulf %0, %2 : vector<168x196xf32>
    %c0_3 = arith.constant 0 : index
    %c0_4 = arith.constant 0 : index
    %4 = vector.load %arg4[%c0_3, %c0_4] : memref<168x196xf32, #tpu.memory_space<vmem>>, vector<168x196xf32>
    tpu.vector_store %arg4[%c0_3, %c0_4], %3 {strides = array<i32>} : memref<168x196xf32, #tpu.memory_space<vmem>>, vector<168x196xf32>,
    return
  }
  func.func @transform_0(%arg0: i32, %arg1: i32) -> (i32, i32) {
    %c0_i32 = arith.constant 0 : i32
    %c0_i32_0 = arith.constant 0 : i32
    return %arg0, %c0_i32 : i32, i32
  }
  func.func @transform_1(%arg0: i32, %arg1: i32) -> (i32, i32) {
    %c0_i32 = arith.constant 0 : i32
    return %arg0, %arg1 : i32, i32
  }
  func.func @transform_2(%arg0: i32, %arg1: i32) -> (i32, i32) {
    %c0_i32 = arith.constant 0 : i32
    return %arg0, %arg1 : i32, i32
  }
}

</mosaic_0001>

<bundles_post_ra>
// kernel: tpu_custom_call.1
= control target key start
LH: loop header
LB: loop body
LE: loop exit
PB: predicated region body
PF: predicated region fallthrough
CT: control target
= control target key end

     0   :  { %s649_s9 = smov 0   ;;  %s651_s10 = smov 0   ;;  %s821_s0 = inlined_call_operand.vmem [shape: f32[672,1], index: 0, kind: input, shape index: {}]   ;;  %s822_s1 = inlined_call_operand.vmem [shape: f32[672,196], index: 1, kind: input, shape index: {}]   ;;  %s823_s2 = inlined_call_operand.vmem [shape: f32[672,196], index: 2, kind: output, shape index: {}]  }
   0x1   :  { %s653_s11 = smov 0  }
   0x2 LB: > { %s24_s12 = sadd.s32 1, %s627_s10  ;;  %p572_p0 = scmp.ge.s32.totalorder %s631_s11, 1  ;;  %s631_s11 = sphi %s653_s11, %s12_s11   ;;  %s627_s10 = sphi %s651_s10, %s825_s10   ;;  %s623_s9 = sphi %s649_s9, %s824_s9  }
   0x3   : > { %p26_p1 = scmp.ge.s32.totalorder %s24_s12, 4  ;;  %p146_p2 = scmp.lt.s32.totalorder %s631_s11, 5 }
   0x5   : > { %s827_s12 = smov (%p26_p1, %s24_s12), 0  ;;  %p147_p3 = pnand %p572_p0, %p146_p2 }
   0x6   : > { %s183_s13 = smul.u32 (!%p147_p3), 21, %s623_s9  ;;  %v633_v0 = vmov (!%p147_p3), 0   ;;  %vm424_vm0 = vcmask (!%p147_p3), 556032  }
   0x7   : > { %150 = sbr.rel (%p147_p3) target bundleno = 189 (0xbd), region = 28  ;;  %608 = vset.pattern.permute.xlu1 (!%p147_p3), %v633_v0  ;;  %607 = vset.pattern.permute.xlu0 (!%p147_p3), %v633_v0 }
   0x8   : > { %p184_p4 = scmp.lt.s32.totalorder (!%p147_p3), %s183_s13, 83 }
   0xe   : > { %s829_s13 = smov (!%p184_p4, %s183_s13), 83 }
   0xf   : > { %s573_s14 = sshll.u32 %s829_s13, 3  ;;  %s580_s18 = sshll.u32 %s829_s13, 4 }
  0x10   : > { %s673_s17 = scalar_lea.vmem %s821_s0, %s573_s14  ;;  %s700_s21 = scalar_lea.vmem %s822_s1, %s580_s18 }
  0x11   : > { %v257_v1 = vld [vmem:[%s673_s17 + $0x10] sm:$0xff]  ;;  %v255_v2 = vld [vmem:[%s673_s17] sm:$0xff]  ;;  %v258_v3 = vld [vmem:[%s673_s17 + $0x18] sm:$0xff]  ;;  %s709_s24 = scalar_lea.vmem %s823_s2, %s580_s18 }
  0x12   : > { %288 = vperm.xlu1 %608, %v257_v1   ;;  %278 = vperm.xlu0 %607, %v255_v2   ;;  %v256_v4 = vld [vmem:[%s673_s17 + $0x8] sm:$0xff]  ;;  %v259_v6 = vld [vmem:[%s673_s17 + $0x20] sm:$0xff]  ;;  %v262_v7 = vld [vmem:[%s673_s17 + $0x38] sm:$0xff] }
  0x13   : > { %v260_v5 = vld [vmem:[%s673_s17 + $0x28] sm:$0xff]  ;;  %v261_v8 = vld [vmem:[%s673_s17 + $0x30] sm:$0xff]  ;;  %v263_v10 = vld [vmem:[%s673_s17 + $0x40] sm:$0xff] }
  0x14   : > { %v264_v9 = vld [vmem:[%s673_s17 + $0x48] sm:$0xff]  ;;  %v266_v11 = vld [vmem:[%s673_s17 + $0x58] sm:$0xff]  ;;  %v265_v12 = vld [vmem:[%s673_s17 + $0x50] sm:$0xff] }
  0x15   : > { %v268_v13 = vld [vmem:[%s673_s17 + $0x68] sm:$0xff]  ;;  %v267_v14 = vld [vmem:[%s673_s17 + $0x60] sm:$0xff]  ;;  %v270_v15 = vld [vmem:[%s673_s17 + $0x78] sm:$0xff] }
  0x16   : > { %293 = vperm.xlu1 %608, %v258_v3   ;;  %283 = vperm.xlu0 %607, %v256_v4   ;;  %v269_v16 = vld [vmem:[%s673_s17 + $0x70] sm:$0xff]  ;;  %v272_v17 = vld [vmem:[%s673_s17 + $0x88] sm:$0xff]  ;;  %v271_v18 = vld [vmem:[%s673_s17 + $0x80] sm:$0xff] }
  0x17   : > { %v274_v19 = vld [vmem:[%s673_s17 + $0x98] sm:$0xff]  ;;  %v273_v20 = vld [vmem:[%s673_s17 + $0x90] sm:$0xff]  ;;  %v275_v21 = vld [vmem:[%s673_s17 + $0xa0] sm:$0xff] }
  0x18   : > { %v217_v22 = vld [vmem:[%s700_s21 + $0x20] sm:$0xff]  ;;  %v218_v23 = vld [vmem:[%s700_s21 + $0x28] sm:$0xff]  ;;  %v219_v32 = vld [vmem:[%s700_s21 + $0x30] sm:$0xff] }
  0x19   : > { %v213_v24 = vld [vmem:[%s700_s21] sm:$0xff]  ;;  %v214_v25 = vld [vmem:[%s700_s21 + $0x8] sm:$0xff]  ;;  %v220_v33 = vld [vmem:[%s700_s21 + $0x38] sm:$0xff] }
  0x1a   : > { %303 = vperm.xlu1 %608, %v260_v5   ;;  %298 = vperm.xlu0 %607, %v259_v6   ;;  %v215_v34 = vld [vmem:[%s700_s21 + $0x10] sm:$0xff]  ;;  %v216_v35 = vld [vmem:[%s700_s21 + $0x18] sm:$0xff]  ;;  %v221_v44 = vld [vmem:[%s700_s21 + $0x40] sm:$0xff] }
  0x1b   : > { %v223_v42 = vld [vmem:[%s700_s21 + $0x50] sm:$0xff]  ;;  %v224_v43 = vld [vmem:[%s700_s21 + $0x58] sm:$0xff]  ;;  %v222_v45 = vld [vmem:[%s700_s21 + $0x48] sm:$0xff] }
  0x1c   : > { %v227_v52 = vld [vmem:[%s700_s21 + $0x70] sm:$0xff]  ;;  %v228_v53 = vld [vmem:[%s700_s21 + $0x78] sm:$0xff]  ;;  %v225_v54 = vld [vmem:[%s700_s21 + $0x60] sm:$0xff] }
  0x1d   : > { %v226_v55 = vld [vmem:[%s700_s21 + $0x68] sm:$0xff]  ;;  %v231_v62 = vld [vmem:[%s700_s21 + $0x90] sm:$0xff]  ;;  %v232_v63 = vld [vmem:[%s700_s21 + $0x98] sm:$0xff] }
  0x1e   : > { %313 = vperm.xlu1 %608, %v262_v7   ;;  %308 = vperm.xlu0 %607, %v261_v8   ;;  %v229_v0 = vld [vmem:[%s700_s21 + $0x80] sm:$0xff]  ;;  %v230_v1 = vld [vmem:[%s700_s21 + $0x88] sm:$0xff]  ;;  %v235_v8 = vld [vmem:[%s700_s21 + $0xb0] sm:$0xff] }
  0x22   : > { %323 = vperm.xlu1 %608, %v264_v9   ;;  %318 = vperm.xlu0 %607, %v263_v10   ;;  %v236_v9 = vld [vmem:[%s700_s21 + $0xb8] sm:$0xff]  ;;  %v233_v10 = vld [vmem:[%s700_s21 + $0xa0] sm:$0xff] }
  0x26   : > { %333 = vperm.xlu1 %608, %v266_v11   ;;  %328 = vperm.xlu0 %607, %v265_v12   ;;  %v234_v11 = vld [vmem:[%s700_s21 + $0xa8] sm:$0xff] }
  0x2a   : > { %343 = vperm.xlu1 %608, %v268_v13   ;;  %338 = vperm.xlu0 %607, %v267_v14  }
  0x2e   : > { %353 = vperm.xlu1 %608, %v270_v15   ;;  %348 = vperm.xlu0 %607, %v269_v16  }
  0x32   : > { %363 = vperm.xlu1 %608, %v272_v17   ;;  %358 = vperm.xlu0 %607, %v271_v18   ;;  %v239_v18 = vld [vmem:[%s700_s21 + $0xd0] sm:$0xff] }
  0x36   : > { %373 = vperm.xlu1 %608, %v274_v19   ;;  %368 = vperm.xlu0 %607, %v273_v20   ;;  %v240_v19 = vld [vmem:[%s700_s21 + $0xd8] sm:$0xff]  ;;  %v237_v20 = vld [vmem:[%s700_s21 + $0xc0] sm:$0xff] }
  0x3a   : > { %378 = vperm.xlu0 %607, %v275_v21   ;;  %v238_v21 = vld [vmem:[%s700_s21 + $0xc8] sm:$0xff] }
  0x91   : > { %v289_v26 = vpop.permute.xlu1 %288  ;;  %v279_v27 = vpop.permute.xlu0 %278 }
  0x92   : > { %v385_v28 = vmul.f32 %v289_v26, %v217_v22  ;;  %v386_v29 = vmul.f32 %v289_v26, %v218_v23  ;;  %v381_v30 = vmul.f32 %v279_v27, %v213_v24  ;;  %v382_v31 = vmul.f32 %v279_v27, %v214_v25 }
  0x94   : > { %428 = vst [vmem:[%s709_s24 + $0x20] sm:$0xff] %v385_v28  ;;  %429 = vst.msk [vmem:[%s709_s24 + $0x28] sm:$0xff] %vm424_vm0, %v386_v29  ;;  %v243_v28 = vld [vmem:[%s700_s21 + $0xf0] sm:$0xff]  ;;  %v244_v29 = vld [vmem:[%s700_s21 + $0xf8] sm:$0xff] }
  0x95   : > { %423 = vst [vmem:[%s709_s24] sm:$0xff] %v381_v30  ;;  %425 = vst.msk [vmem:[%s709_s24 + $0x8] sm:$0xff] %vm424_vm0, %v382_v31  ;;  %v294_v36 = vpop.permute.xlu1 %293  ;;  %v284_v37 = vpop.permute.xlu0 %283  ;;  %v241_v30 = vld [vmem:[%s700_s21 + $0xe0] sm:$0xff]  ;;  %v242_v31 = vld [vmem:[%s700_s21 + $0xe8] sm:$0xff] }
  0x96   : > { %v387_v38 = vmul.f32 %v294_v36, %v219_v32  ;;  %v388_v39 = vmul.f32 %v294_v36, %v220_v33  ;;  %v383_v40 = vmul.f32 %v284_v37, %v215_v34  ;;  %v384_v41 = vmul.f32 %v284_v37, %v216_v35 }
  0x98   : > { %430 = vst [vmem:[%s709_s24 + $0x30] sm:$0xff] %v387_v38  ;;  %431 = vst.msk [vmem:[%s709_s24 + $0x38] sm:$0xff] %vm424_vm0, %v388_v39  ;;  %v247_v38 = vld [vmem:[%s700_s21 + $0x110] sm:$0xff]  ;;  %v248_v39 = vld [vmem:[%s700_s21 + $0x118] sm:$0xff] }
  0x99   : > { %426 = vst [vmem:[%s709_s24 + $0x10] sm:$0xff] %v383_v40  ;;  %427 = vst.msk [vmem:[%s709_s24 + $0x18] sm:$0xff] %vm424_vm0, %v384_v41  ;;  %v304_v46 = vpop.permute.xlu1 %303  ;;  %v299_v47 = vpop.permute.xlu0 %298  ;;  %v245_v40 = vld [vmem:[%s700_s21 + $0x100] sm:$0xff]  ;;  %v246_v41 = vld [vmem:[%s700_s21 + $0x108] sm:$0xff] }
  0x9a   : > { %v391_v48 = vmul.f32 %v304_v46, %v223_v42  ;;  %v392_v49 = vmul.f32 %v304_v46, %v224_v43  ;;  %v389_v50 = vmul.f32 %v299_v47, %v221_v44  ;;  %v390_v51 = vmul.f32 %v299_v47, %v222_v45 }
  0x9c   : > { %434 = vst [vmem:[%s709_s24 + $0x50] sm:$0xff] %v391_v48  ;;  %435 = vst.msk [vmem:[%s709_s24 + $0x58] sm:$0xff] %vm424_vm0, %v392_v49  ;;  %v251_v48 = vld [vmem:[%s700_s21 + $0x130] sm:$0xff]  ;;  %v252_v49 = vld [vmem:[%s700_s21 + $0x138] sm:$0xff] }
  0x9d   : > { %432 = vst [vmem:[%s709_s24 + $0x40] sm:$0xff] %v389_v50  ;;  %433 = vst.msk [vmem:[%s709_s24 + $0x48] sm:$0xff] %vm424_vm0, %v390_v51  ;;  %v314_v56 = vpop.permute.xlu1 %313  ;;  %v309_v57 = vpop.permute.xlu0 %308  ;;  %v249_v50 = vld [vmem:[%s700_s21 + $0x120] sm:$0xff]  ;;  %v250_v51 = vld [vmem:[%s700_s21 + $0x128] sm:$0xff] }
  0x9e   : > { %v395_v58 = vmul.f32 %v314_v56, %v227_v52  ;;  %v396_v59 = vmul.f32 %v314_v56, %v228_v53  ;;  %v393_v60 = vmul.f32 %v309_v57, %v225_v54  ;;  %v394_v61 = vmul.f32 %v309_v57, %v226_v55 }
  0xa0   : > { %438 = vst [vmem:[%s709_s24 + $0x70] sm:$0xff] %v395_v58  ;;  %439 = vst.msk [vmem:[%s709_s24 + $0x78] sm:$0xff] %vm424_vm0, %v396_v59  ;;  %v253_v58 = vld [vmem:[%s700_s21 + $0x140] sm:$0xff]  ;;  %v254_v59 = vld [vmem:[%s700_s21 + $0x148] sm:$0xff] }
  0xa1   : > { %436 = vst [vmem:[%s709_s24 + $0x60] sm:$0xff] %v393_v60  ;;  %437 = vst.msk [vmem:[%s709_s24 + $0x68] sm:$0xff] %vm424_vm0, %v394_v61  ;;  %v324_v2 = vpop.permute.xlu1 %323  ;;  %v319_v3 = vpop.permute.xlu0 %318 }
  0xa2   : > { %v399_v4 = vmul.f32 %v324_v2, %v231_v62  ;;  %v400_v5 = vmul.f32 %v324_v2, %v232_v63  ;;  %v397_v6 = vmul.f32 %v319_v3, %v229_v0  ;;  %v398_v7 = vmul.f32 %v319_v3, %v230_v1 }
  0xa4   : > { %442 = vst [vmem:[%s709_s24 + $0x90] sm:$0xff] %v399_v4  ;;  %443 = vst.msk [vmem:[%s709_s24 + $0x98] sm:$0xff] %vm424_vm0, %v400_v5 }
  0xa5   : > { %440 = vst [vmem:[%s709_s24 + $0x80] sm:$0xff] %v397_v6  ;;  %441 = vst.msk [vmem:[%s709_s24 + $0x88] sm:$0xff] %vm424_vm0, %v398_v7  ;;  %v334_v12 = vpop.permute.xlu1 %333  ;;  %v329_v13 = vpop.permute.xlu0 %328 }
  0xa6   : > { %v403_v14 = vmul.f32 %v334_v12, %v235_v8  ;;  %v404_v15 = vmul.f32 %v334_v12, %v236_v9  ;;  %v401_v16 = vmul.f32 %v329_v13, %v233_v10  ;;  %v402_v17 = vmul.f32 %v329_v13, %v234_v11 }
  0xa8   : > { %446 = vst [vmem:[%s709_s24 + $0xb0] sm:$0xff] %v403_v14  ;;  %447 = vst.msk [vmem:[%s709_s24 + $0xb8] sm:$0xff] %vm424_vm0, %v404_v15 }
  0xa9   : > { %444 = vst [vmem:[%s709_s24 + $0xa0] sm:$0xff] %v401_v16  ;;  %445 = vst.msk [vmem:[%s709_s24 + $0xa8] sm:$0xff] %vm424_vm0, %v402_v17  ;;  %v344_v22 = vpop.permute.xlu1 %343  ;;  %v339_v23 = vpop.permute.xlu0 %338 }
  0xaa   : > { %v407_v24 = vmul.f32 %v344_v22, %v239_v18  ;;  %v408_v25 = vmul.f32 %v344_v22, %v240_v19  ;;  %v405_v26 = vmul.f32 %v339_v23, %v237_v20  ;;  %v406_v27 = vmul.f32 %v339_v23, %v238_v21 }
  0xac   : > { %450 = vst [vmem:[%s709_s24 + $0xd0] sm:$0xff] %v407_v24  ;;  %451 = vst.msk [vmem:[%s709_s24 + $0xd8] sm:$0xff] %vm424_vm0, %v408_v25 }
  0xad   : > { %448 = vst [vmem:[%s709_s24 + $0xc0] sm:$0xff] %v405_v26  ;;  %449 = vst.msk [vmem:[%s709_s24 + $0xc8] sm:$0xff] %vm424_vm0, %v406_v27  ;;  %v354_v32 = vpop.permute.xlu1 %353  ;;  %v349_v33 = vpop.permute.xlu0 %348 }
  0xae   : > { %v411_v34 = vmul.f32 %v354_v32, %v243_v28  ;;  %v412_v35 = vmul.f32 %v354_v32, %v244_v29  ;;  %v409_v36 = vmul.f32 %v349_v33, %v241_v30  ;;  %v410_v37 = vmul.f32 %v349_v33, %v242_v31 }
  0xb0   : > { %454 = vst [vmem:[%s709_s24 + $0xf0] sm:$0xff] %v411_v34  ;;  %455 = vst.msk [vmem:[%s709_s24 + $0xf8] sm:$0xff] %vm424_vm0, %v412_v35 }
  0xb1   : > { %452 = vst [vmem:[%s709_s24 + $0xe0] sm:$0xff] %v409_v36  ;;  %453 = vst.msk [vmem:[%s709_s24 + $0xe8] sm:$0xff] %vm424_vm0, %v410_v37  ;;  %v364_v42 = vpop.permute.xlu1 %363  ;;  %v359_v43 = vpop.permute.xlu0 %358 }
  0xb2   : > { %v415_v44 = vmul.f32 %v364_v42, %v247_v38  ;;  %v416_v45 = vmul.f32 %v364_v42, %v248_v39  ;;  %v413_v46 = vmul.f32 %v359_v43, %v245_v40  ;;  %v414_v47 = vmul.f32 %v359_v43, %v246_v41 }
  0xb4   : > { %458 = vst [vmem:[%s709_s24 + $0x110] sm:$0xff] %v415_v44  ;;  %459 = vst.msk [vmem:[%s709_s24 + $0x118] sm:$0xff] %vm424_vm0, %v416_v45 }
  0xb5   : > { %456 = vst [vmem:[%s709_s24 + $0x100] sm:$0xff] %v413_v46  ;;  %457 = vst.msk [vmem:[%s709_s24 + $0x108] sm:$0xff] %vm424_vm0, %v414_v47  ;;  %v374_v52 = vpop.permute.xlu1 %373  ;;  %v369_v53 = vpop.permute.xlu0 %368 }
  0xb6   : > { %v419_v54 = vmul.f32 %v374_v52, %v251_v48  ;;  %v420_v55 = vmul.f32 %v374_v52, %v252_v49  ;;  %v417_v56 = vmul.f32 %v369_v53, %v249_v50  ;;  %v418_v57 = vmul.f32 %v369_v53, %v250_v51 }
  0xb8   : > { %462 = vst [vmem:[%s709_s24 + $0x130] sm:$0xff] %v419_v54  ;;  %463 = vst.msk [vmem:[%s709_s24 + $0x138] sm:$0xff] %vm424_vm0, %v420_v55 }
  0xb9   : > { %460 = vst [vmem:[%s709_s24 + $0x120] sm:$0xff] %v417_v56  ;;  %461 = vst.msk [vmem:[%s709_s24 + $0x128] sm:$0xff] %vm424_vm0, %v418_v57  ;;  %v379_v60 = vpop.permute.xlu0 %378 }
  0xba   : > { %v421_v61 = vmul.f32 %v379_v60, %v253_v58  ;;  %v422_v62 = vmul.f32 %v379_v60, %v254_v59 }
  0xbc   : > { %464 = vst [vmem:[%s709_s24 + $0x140] sm:$0xff] %v421_v61  ;;  %465 = vst.msk [vmem:[%s709_s24 + $0x148] sm:$0xff] %vm424_vm0, %v422_v62 }
  0xbd PF: > { %s12_s11 = sadd.s32 1, %s631_s11   ;;  %s824_s9 = smov %s627_s10 }
  0xbe   : > { %p9_p5 = scmp.ge.s32.totalorder %s12_s11, 6   ;;  %s825_s10 = smov %s827_s12 }
  0xc0   :  { %11 = sbr.rel (!%p9_p5) target bundleno = 2 (0x2), region = 61 }

</bundles_post_ra>
